<compile_context>
chip_gen: v7x
topology: tpu7x:2x2x1
jax: 0.10.0
libtpu: 0.0.40
codegen_flags: <defaults>
</compile_context>

<pallas_src>
import math
import functools

import jax
import jax.numpy as jnp
from jax import lax
from jax.experimental import pallas as pl
from jax.experimental.pallas import tpu as pltpu


# --------------------------------------------------------------------------
# Helpers
# --------------------------------------------------------------------------
def _layernorm(x, w, b, eps=1e-5):
    mu = jnp.mean(x, axis=-1, keepdims=True)
    xc = x - mu
    var = jnp.mean(xc * xc, axis=-1, keepdims=True)
    return xc * lax.rsqrt(var + eps) * w + b


def _round_up(v, m):
    return ((v + m - 1) // m) * m


def _pick_block_q(n, cap=256):
    for cand in (256, 128, 64, 32, 16, 8):
        if cand <= cap and cand <= n and n % cand == 0:
            return cand
    if n <= 512:
        return n
    # TODO(synk): pad ragged sequence lengths instead of a full-N fallback.
    return n


def _vmem_estimate(N, D, hidden, Vpad, block_q):
    scr = N * D * 4 + 3 * N * D * 2 + block_q * D * 2          # h, q/k/v, attn
    io = 2 * N * D * 2 + 2 * N * D * 4                          # h0 + out blocks
    w = 2 * 2 * (3 * D * D + D * D + 2 * D * hidden)            # dbl-buf bf16 weights
    vec = 2 * 8 * Vpad * 4
    work = 4 * block_q * (N + hidden + 3 * D + 4 * D) * 4       # live f32 tiles
    return scr + io + w + vec + work


# --------------------------------------------------------------------------
# Kernel 1: patch embedding (stride==kernel Conv2d as matmul) + pos embed
# --------------------------------------------------------------------------
def patch_embed_kernel(xp_ref, w_ref, b_ref, pos_ref, h0_ref):
    h0 = jnp.dot(xp_ref[0], w_ref[...], preferred_element_type=jnp.float32)
    h0_ref[0] = (h0 + b_ref[...] + pos_ref[...]).astype(h0_ref.dtype)


# --------------------------------------------------------------------------
# Kernel 2: transformer encoder stack + final LayerNorm
# --------------------------------------------------------------------------
def encoder_kernel(h0_ref, vec_ref, qkvw_ref, projw_ref, fc1w_ref, fc2w_ref,
                   lnfw_ref, lnfb_ref,
                   out_ref,
                   h_scr, q_scr, k_scr, v_scr, attn_scr,
                   *, num_heads, block_q, hidden, approx_recip):
    f32 = jnp.float32
    bf16 = jnp.bfloat16
    d = pl.program_id(1)
    depth = pl.num_programs(1)

    N, D = h_scr.shape
    hd = D // num_heads
    scale = 1.0 / math.sqrt(hd)
    n_chunks = N // block_q

    # ---- residual stream init from hoisted patch+pos embedding (d == 0) ----
    @pl.when(d == 0)
    def _init():
        h_scr[...] = h0_ref[0].astype(f32)

    # ---- per-layer packed vectors: one DMA per depth step, sliced here ----
    vecs = vec_ref[0]                                    # (8, Vpad) f32
    ln1w, ln1b = vecs[0:1, :D], vecs[1:2, :D]
    qkvb = vecs[2:3, :3 * D]
    projb = vecs[3:4, :D]
    ln2w, ln2b = vecs[4:5, :D], vecs[5:6, :D]
    fc1b = vecs[6:7, :hidden]
    fc2b = vecs[7:8, :D]

    qkv_w = qkvw_ref[0]                                  # (D, 3D)   bf16
    proj_w = projw_ref[0]                                # (D, D)    bf16
    fc1_w = fc1w_ref[0]                                  # (D, hid)  bf16
    fc2_w = fc2w_ref[0]                                  # (hid, D)  bf16

    # ---- stage 1: fill bf16 Q/K/V scratch chunk-by-chunk (bounded f32) ----
    def qkv_chunk(c, carry):
        start = pl.multiple_of(c * block_q, block_q)
        rows = pl.ds(start, block_q)
        y1 = _layernorm(h_scr[rows, :], ln1w, ln1b).astype(bf16)
        qkv = jnp.dot(y1, qkv_w, preferred_element_type=f32) + qkvb
        q_scr[rows, :] = (qkv[:, 0:D] * scale).astype(bf16)   # pre-scaled Q
        k_scr[rows, :] = qkv[:, D:2 * D].astype(bf16)
        v_scr[rows, :] = qkv[:, 2 * D:3 * D].astype(bf16)
        return carry

    lax.fori_loop(0, n_chunks, qkv_chunk, 0)

    # ---- stage 2: attention + projection + MLP per query chunk ----
    def block_chunk(c, carry):
        start = pl.multiple_of(c * block_q, block_q)
        rows = pl.ds(start, block_q)
        hr = h_scr[rows, :]                              # (Tq, D) f32
        q_rows = q_scr[rows, :]                          # (Tq, D) bf16

        for hh in range(num_heads):
            col = slice(hh * hd, (hh + 1) * hd)
            # scores = q @ k^T without materializing k.T (transpose-free dot)
            s = lax.dot_general(q_rows[:, col], k_scr[:, col],
                                (((1,), (1,)), ((), ())),
                                preferred_element_type=f32)   # (Tq, N)
            s = s - jnp.max(s, axis=-1, keepdims=True)
            p = jnp.exp(s)
            denom = jnp.sum(p, axis=-1, keepdims=True)
            if approx_recip:
                p = p * pl.reciprocal(denom, approx=True)
            else:
                p = p / denom
            o = jnp.dot(p.astype(bf16), v_scr[:, col],
                        preferred_element_type=f32)           # (Tq, hd)
            attn_scr[:, col] = o.astype(bf16)

        attn = attn_scr[...]                             # (Tq, D) bf16
        hc = hr + jnp.dot(attn, proj_w, preferred_element_type=f32) + projb

        # MLP (pre-norm); exact erf GELU to match PyTorch nn.GELU()
        y2 = _layernorm(hc, ln2w, ln2b).astype(bf16)
        z = jnp.dot(y2, fc1_w, preferred_element_type=f32) + fc1b
        z = jax.nn.gelu(z, approximate=False)
        hc = hc + jnp.dot(z.astype(bf16), fc2_w,
                          preferred_element_type=f32) + fc2b

        h_scr[rows, :] = hc
        return carry

    lax.fori_loop(0, n_chunks, block_chunk, 0)

    # ---- final LayerNorm + output store (only on the last depth step) ----
    @pl.when(d == depth - 1)
    def _final():
        out_ref[0] = _layernorm(h_scr[...], lnfw_ref[...], lnfb_ref[...]
                                ).astype(out_ref.dtype)


# --------------------------------------------------------------------------
# Wrapper
# --------------------------------------------------------------------------
def _pack_layer_vectors(params, depth, D, hidden, Vpad):
    v = jnp.zeros((depth, 8, Vpad), jnp.float32)
    entries = [
        (0, params["ln1_w"]), (1, params["ln1_b"]),
        (2, params["qkv_b"]), (3, params["proj_b"]),
        (4, params["ln2_w"]), (5, params["ln2_b"]),
        (6, params["fc1_b"]), (7, params["fc2_b"]),
    ]
    for i, arr in entries:
        v = v.at[:, i, :arr.shape[-1]].set(arr)
    return v


def image_encoder_vit(x_nchw, params, *, patch_size, num_heads,
                      block_q_cap=256, approx_softmax=True):
    B, C, H, W = x_nchw.shape
    P = patch_size
    gh, gw = H // P, W // P
    N = gh * gw
    K = C * P * P
    D = params["w_patch"].shape[1]
    depth = params["qkv_w"].shape[0]
    hidden = params["fc1_w"].shape[2]
    block_q = _pick_block_q(N, cap=block_q_cap)
    n_rows = N // block_q
    bf16 = jnp.bfloat16

    # Patch extraction (glue): (B,C,H,W) -> (B,N,C*P*P) with (C,Ph,Pw) order,
    # so the stride==kernel Conv2d patch embed becomes a plain matmul.
    xp = x_nchw.reshape(B, C, gh, P, gw, P)
    xp = xp.transpose(0, 2, 4, 1, 3, 5).reshape(B, N, K)

    # ---- kernel 1: h0 = patch_embed(x) + pos_embed, bf16 (B, N, D) ----
    h0 = pl.pallas_call(
        patch_embed_kernel,
        out_shape=jax.ShapeDtypeStruct((B, N, D), bf16),
        grid=(B, n_rows),
        in_specs=[
            pl.BlockSpec((1, block_q, K), lambda b, r: (b, r, 0)),
            pl.BlockSpec((K, D), lambda b, r: (0, 0)),
            pl.BlockSpec((1, D), lambda b, r: (0, 0)),
            pl.BlockSpec((block_q, D), lambda b, r: (r, 0)),
        ],
        out_specs=pl.BlockSpec((1, block_q, D), lambda b, r: (b, r, 0)),
        compiler_params=pltpu.CompilerParams(
            dimension_semantics=("parallel", "parallel")),
    )(xp.astype(bf16), params["w_patch"].astype(bf16),
      params["b_patch"].reshape(1, D), params["pos_embed"])

    # ---- packed per-layer vectors ----
    Vpad = _round_up(max(3 * D, hidden, 128), 128)
    vecs = _pack_layer_vectors(params, depth, D, hidden, Vpad)

    # ---- VMEM budget: derive from actual buffer sizes, clamp to chip ----
    vmem_limit = int(min(max(_vmem_estimate(N, D, hidden, Vpad, block_q),
                             32 * 1024 * 1024), 100 * 1024 * 1024))
    try:
        cap = pltpu.get_tpu_info().vmem_capacity_bytes
        vmem_limit = int(min(vmem_limit, cap - (8 << 20)))
    except Exception:
        pass

    kernel = functools.partial(encoder_kernel, num_heads=num_heads,
                               block_q=block_q, hidden=hidden,
                               approx_recip=approx_softmax)

    def layer_spec(shape):
        r = len(shape)
        return pl.BlockSpec((1,) + tuple(shape[1:]),
                            lambda b, d, _r=r: (d,) + (0,) * (_r - 1))

    out = pl.pallas_call(
        kernel,
        out_shape=jax.ShapeDtypeStruct((B, N, D), jnp.float32),
        grid=(B, depth),
        in_specs=[
            pl.BlockSpec((1, N, D), lambda b, d: (b, 0, 0)),        # h0 (bf16)
            layer_spec((depth, 8, Vpad)),                           # packed vecs
            layer_spec((depth, D, 3 * D)),                          # qkv_w
            layer_spec((depth, D, D)),                              # proj_w
            layer_spec((depth, D, hidden)),                         # fc1_w
            layer_spec((depth, hidden, D)),                         # fc2_w
            pl.BlockSpec((1, D), lambda b, d: (0, 0)),              # final LN w
            pl.BlockSpec((1, D), lambda b, d: (0, 0)),              # final LN b
        ],
        out_specs=pl.BlockSpec((1, N, D), lambda b, d: (b, 0, 0)),
        scratch_shapes=[
            pltpu.VMEM((N, D), jnp.float32),        # residual stream (persists)
            pltpu.VMEM((N, D), jnp.bfloat16),       # Q (pre-scaled)
            pltpu.VMEM((N, D), jnp.bfloat16),       # K
            pltpu.VMEM((N, D), jnp.bfloat16),       # V
            pltpu.VMEM((block_q, D), jnp.bfloat16),  # per-chunk multi-head out
        ],
        compiler_params=pltpu.CompilerParams(
            dimension_semantics=("parallel", "arbitrary"),
            vmem_limit_bytes=vmem_limit,
        ),
    )(h0, vecs,
      params["qkv_w"].astype(bf16), params["proj_w"].astype(bf16),
      params["fc1_w"].astype(bf16), params["fc2_w"].astype(bf16),
      params["lnf_w"].reshape(1, D), params["lnf_b"].reshape(1, D))
    return out


# --------------------------------------------------------------------------
# Deterministic parameter construction (matches module __init__ shapes/init)
# --------------------------------------------------------------------------
def get_posembed(embed_dim, grid_size, temperature=10000.0):
    scale = 2.0 * math.pi
    num_pos_feats = embed_dim // 2
    y = jnp.arange(grid_size, dtype=jnp.float32)
    x = jnp.arange(grid_size, dtype=jnp.float32)
    y_embed, x_embed = jnp.meshgrid(y, x, indexing="ij")
    y_embed = y_embed / (grid_size + 1e-6) * scale
    x_embed = x_embed / (grid_size + 1e-6) * scale
    dim_t = jnp.arange(num_pos_feats, dtype=jnp.float32)
    dim_t_ = jnp.floor_divide(dim_t, 2.0) / num_pos_feats
    dim_t = temperature ** (2.0 * dim_t_)
    pos_x = x_embed[..., None] / dim_t
    pos_y = y_embed[..., None] / dim_t
    pos_x = jnp.stack((jnp.sin(pos_x[..., 0::2]), jnp.cos(pos_x[..., 1::2])),
                      axis=-1).reshape(grid_size, grid_size, num_pos_feats)
    pos_y = jnp.stack((jnp.sin(pos_y[..., 0::2]), jnp.cos(pos_y[..., 1::2])),
                      axis=-1).reshape(grid_size, grid_size, num_pos_feats)
    pos = jnp.concatenate((pos_y, pos_x), axis=-1).reshape(-1, embed_dim)
    return pos.astype(jnp.float32)                            # (N, D)


def xavier_uniform(key, fan_in, fan_out):
    bound = math.sqrt(6.0 / (fan_in + fan_out))
    return jax.random.uniform(key, (fan_in, fan_out), jnp.float32, -bound, bound)


def make_params(key, *, img_size, patch_size, in_chans, D, depth, num_heads,
                mlp_ratio):
    del num_heads
    grid = img_size // patch_size
    K = in_chans * patch_size * patch_size
    hidden = int(D * mlp_ratio)
    keys = iter(jax.random.split(key, 4 * depth + 4))

    def stack(fi, fo):
        return jnp.stack([xavier_uniform(next(keys), fi, fo)
                          for _ in range(depth)], axis=0)

    return dict(
        w_patch=xavier_uniform(next(keys), K, D),
        b_patch=jnp.zeros((D,), jnp.float32),
        pos_embed=get_posembed(D, grid),
        ln1_w=jnp.ones((depth, D), jnp.float32),
        ln1_b=jnp.zeros((depth, D), jnp.float32),
        qkv_w=stack(D, 3 * D),
        qkv_b=jnp.zeros((depth, 3 * D), jnp.float32),
        proj_w=stack(D, D),
        proj_b=jnp.zeros((depth, D), jnp.float32),
        ln2_w=jnp.ones((depth, D), jnp.float32),
        ln2_b=jnp.zeros((depth, D), jnp.float32),
        fc1_w=stack(D, hidden),
        fc1_b=jnp.zeros((depth, hidden), jnp.float32),
        fc2_w=stack(hidden, D),
        fc2_b=jnp.zeros((depth, D), jnp.float32),
        lnf_w=jnp.ones((D,), jnp.float32),
        lnf_b=jnp.zeros((D,), jnp.float32),
    )


# --------------------------------------------------------------------------
# Pure-JAX f32 reference (PyTorch-equivalent math) for a sanity check
# --------------------------------------------------------------------------
def reference_forward(x_nchw, params, *, patch_size, num_heads):
    B, C, H, W = x_nchw.shape
    P = patch_size
    gh, gw = H // P, W // P
    N = gh * gw
    D = params["w_patch"].shape[1]
    hd = D // num_heads

    xp = x_nchw.reshape(B, C, gh, P, gw, P).transpose(0, 2, 4, 1, 3, 5)
    xp = xp.reshape(B, N, C * P * P)
    h = xp @ params["w_patch"] + params["b_patch"] + params["pos_embed"]

    def ln(x, w, b, eps=1e-5):
        mu = x.mean(-1, keepdims=True)
        var = ((x - mu) ** 2).mean(-1, keepdims=True)
        return (x - mu) / jnp.sqrt(var + eps) * w + b

    depth = params["ln1_w"].shape[0]
    for d in range(depth):
        y = ln(h, params["ln1_w"][d], params["ln1_b"][d])
        qkv = y @ params["qkv_w"][d] + params["qkv_b"][d]
        q, k, v = qkv[..., :D], qkv[..., D:2 * D], qkv[..., 2 * D:]
        q = q.reshape(B, N, num_heads, hd).transpose(0, 2, 1, 3)
        k = k.reshape(B, N, num_heads, hd).transpose(0, 2, 1, 3)
        v = v.reshape(B, N, num_heads, hd).transpose(0, 2, 1, 3)
        s = jnp.einsum("bhqd,bhkd->bhqk", q, k) / math.sqrt(hd)
        p = jax.nn.softmax(s, axis=-1)
        a = jnp.einsum("bhqk,bhkd->bhqd", p, v).transpose(0, 2, 1, 3)
        a = a.reshape(B, N, D)
        h = h + (a @ params["proj_w"][d] + params["proj_b"][d])
        y = ln(h, params["ln2_w"][d], params["ln2_b"][d])
        z = jax.nn.gelu(y @ params["fc1_w"][d] + params["fc1_b"][d],
                        approximate=False)
        h = h + (z @ params["fc2_w"][d] + params["fc2_b"][d])
    return ln(h, params["lnf_w"], params["lnf_b"])


# --------------------------------------------------------------------------
if __name__ == "__main__":
    # Small config: img 16, patch 4 -> 16 patches, embed dim 32, 2 blocks.
    IMG, PATCH, CIN = 16, 4, 4
    D, DEPTH, HEADS, MLP_RATIO = 32, 2, 4, 4.0
    B = 2

    key = jax.random.PRNGKey(0)
    kx, kp = jax.random.split(key)
    x = jax.random.normal(kx, (B, CIN, IMG, IMG), jnp.float32)
    params = make_params(kp, img_size=IMG, patch_size=PATCH, in_chans=CIN,
                         D=D, depth=DEPTH, num_heads=HEADS,
                         mlp_ratio=MLP_RATIO)

    out = image_encoder_vit(x, params, patch_size=PATCH, num_heads=HEADS)
    out = jax.block_until_ready(out)

    ref = reference_forward(x, params, patch_size=PATCH, num_heads=HEADS)
    assert out.shape == (B, (IMG // PATCH) ** 2, D)
    # bf16 matmul operands / bf16 h0 / approx softmax reciprocal -> loose
    # tolerance versus the f32 reference.
    err = float(jnp.max(jnp.abs(out - ref)))
    assert err < 5e-2, err

    print("KERNEL_OK")
</pallas_src>

<mosaic_0001>
module attributes {stable_mosaic.version = 11 : i64} {
  func.func @patch_embed_kernel(%arg0: i32, %arg1: i32, %arg2: memref<1x16x64xbf16, #tpu.memory_space<vmem>>, %arg3: memref<64x32xbf16, #tpu.memory_space<vmem>>, %arg4: memref<1x32xf32, #tpu.memory_space<vmem>>, %arg5: memref<16x32xf32, #tpu.memory_space<vmem>>, %arg6: memref<1x16x32xbf16, #tpu.memory_space<vmem>>) attributes {dimension_semantics = [#tpu.dimension_semantics<parallel>, #tpu.dimension_semantics<parallel>], iteration_bounds = array<i64: 2, 1>, scalar_prefetch = 0 : i64, scratch_operands = 0 : i64, tpu.core_type = #tpu.core_type<tc>, window_params = [{transform_indices = @transform_0, window_bounds = array<i64: 1, 16, 64>}, {pipeline_mode = #tpu.pipeline_mode<synchronous>, transform_indices = @transform_1, window_bounds = array<i64: 64, 32>}, {pipeline_mode = #tpu.pipeline_mode<synchronous>, transform_indices = @transform_2, window_bounds = array<i64: 1, 32>}, {transform_indices = @transform_3, window_bounds = array<i64: 16, 32>}, {transform_indices = @transform_4, window_bounds = array<i64: 1, 16, 32>}]} {
    %c0 = arith.constant 0 : index
    %c0_0 = arith.constant 0 : index
    %c0_1 = arith.constant 0 : index
    %0 = vector.load %arg2[%c0, %c0_0, %c0_1] : memref<1x16x64xbf16, #tpu.memory_space<vmem>>, vector<1x16x64xbf16>
    %1 = vector.shape_cast %0 : vector<1x16x64xbf16> to vector<16x64xbf16>
    %c0_2 = arith.constant 0 : index
    %c0_3 = arith.constant 0 : index
    %2 = vector.load %arg3[%c0_2, %c0_3] : memref<64x32xbf16, #tpu.memory_space<vmem>>, vector<64x32xbf16>
    %cst = arith.constant dense<0.000000e+00> : vector<16x32xf32>
    %3 = tpu.matmul %1, %2, %cst {dimension_numbers = #tpu.dot_dimension_numbers<[1], [0], [0], [1], [0, 0, 1, 1], [], []>} : vector<16x64xbf16>, vector<64x32xbf16>, vector<16x32xf32> -> vector<16x32xf32>
    %c0_4 = arith.constant 0 : index
    %c0_5 = arith.constant 0 : index
    %4 = vector.load %arg4[%c0_4, %c0_5] : memref<1x32xf32, #tpu.memory_space<vmem>>, vector<1x32xf32>
    %5 = vector.broadcast %4 : vector<1x32xf32> to vector<16x32xf32>
    %6 = arith.addf %3, %5 : vector<16x32xf32>
    %c0_6 = arith.constant 0 : index
    %c0_7 = arith.constant 0 : index
    %7 = vector.load %arg5[%c0_6, %c0_7] : memref<16x32xf32, #tpu.memory_space<vmem>>, vector<16x32xf32>
    %8 = arith.addf %6, %7 : vector<16x32xf32>
    %9 = arith.truncf %8 : vector<16x32xf32> to vector<16x32xbf16>
    %c0_8 = arith.constant 0 : index
    %c0_9 = arith.constant 0 : index
    %c0_10 = arith.constant 0 : index
    %10 = vector.load %arg6[%c0_8, %c0_9, %c0_10] : memref<1x16x32xbf16, #tpu.memory_space<vmem>>, vector<1x16x32xbf16>
    %11 = vector.shape_cast %10 : vector<1x16x32xbf16> to vector<16x32xbf16>
    %12 = vector.shape_cast %9 : vector<16x32xbf16> to vector<1x16x32xbf16>
    tpu.vector_store %arg6[%c0_8, %c0_9, %c0_10], %12 {strides = array<i32>} : memref<1x16x32xbf16, #tpu.memory_space<vmem>>, vector<1x16x32xbf16>,
    return
  }
  func.func @transform_0(%arg0: i32, %arg1: i32) -> (i32, i32, i32) {
    %c0_i32 = arith.constant 0 : i32
    %c0_i32_0 = arith.constant 0 : i32
    return %arg0, %arg1, %c0_i32 : i32, i32, i32
  }
  func.func @transform_1(%arg0: i32, %arg1: i32) -> (i32, i32) {
    %c0_i32 = arith.constant 0 : i32
    %c0_i32_0 = arith.constant 0 : i32
    %c0_i32_1 = arith.constant 0 : i32
    return %c0_i32, %c0_i32_0 : i32, i32
  }
  func.func @transform_2(%arg0: i32, %arg1: i32) -> (i32, i32) {
    %c0_i32 = arith.constant 0 : i32
    %c0_i32_0 = arith.constant 0 : i32
    %c0_i32_1 = arith.constant 0 : i32
    return %c0_i32, %c0_i32_0 : i32, i32
  }
  func.func @transform_3(%arg0: i32, %arg1: i32) -> (i32, i32) {
    %c0_i32 = arith.constant 0 : i32
    %c0_i32_0 = arith.constant 0 : i32
    return %arg1, %c0_i32 : i32, i32
  }
  func.func @transform_4(%arg0: i32, %arg1: i32) -> (i32, i32, i32) {
    %c0_i32 = arith.constant 0 : i32
    %c0_i32_0 = arith.constant 0 : i32
    return %arg0, %arg1, %c0_i32 : i32, i32, i32
  }
}

</mosaic_0001>

<bundles_post_ra>
// kernel: tpu_custom_call.1
= control target key start
LH: loop header
LB: loop body
LE: loop exit
PB: predicated region body
PF: predicated region fallthrough
CT: control target
= control target key end

     0   :  { %9 = vsyncpa [#allocation3], 0  ;;  %s820_s0 = inlined_call_operand.vmem [shape: bf16[2,16,64], index: 0, kind: input, shape index: {}]   ;;  %s821_s1 = inlined_call_operand.vmem [shape: bf16[64,32], index: 1, kind: input, shape index: {}]   ;;  %s822_s2 = inlined_call_operand.vmem [shape: f32[1,32], index: 2, kind: input, shape index: {}]   ;;  %s823_s3 = inlined_call_operand.vmem [shape: f32[16,32], index: 3, kind: input, shape index: {}]   ;;  %s824_s4 = inlined_call_operand.hbm [shape: bf16[2,16,32], index: 4, kind: output, shape index: {}]  }
   0x1   :  { %11 = vsyncpa [#allocation3 + $0x1], 0  ;;  %s684_s15 = smov 0   ;;  %s686_s16 = smov 0  }
   0x2   :  { %s688_s17 = smov 0   ;;  %s690_s18 = smov 0  }
   0x3   :  { %s692_s19 = smov 0   ;;  %s694_s20 = smov 0  }
   0x4 LB: > { %s466_s21 = sadd.s32 4294967295, %s652_s20   ;;  %s467_s22 = sadd.s32 4294967294, %s652_s20   ;;  %s652_s20 = sphi %s694_s20, %s17_s20   ;;  %s648_s19 = sphi %s692_s19, %s831_s19   ;;  %s644_s18 = sphi %s690_s18, %s830_s18   ;;  %s640_s17 = sphi %s688_s17, %s829_s17   ;;  %s636_s16 = sphi %s686_s16, %s828_s16   ;;  %s632_s15 = sphi %s684_s15, %s827_s15  }
   0x5   : > { %s29_s23 = sadd.s32 1, %s648_s19  ;;  %s134_s24 = sadd.s32 1, %s640_s17 }
   0x6   : > { %p31_p0 = scmp.ge.s32.totalorder %s29_s23, 2  ;;  %p144_p1 = scmp.ne.s32.totalorder %s640_s17, %s636_s16 }
   0x7   : > { %p145_p2 = scmp.eq.s32.totalorder %s466_s21, 1  ;;  %p150_p3 = scmp.ne.s32.totalorder %s636_s16, %s632_s15 }
   0x8   : > { %s833_s23 = smov (%p31_p0, %s29_s23), 0  ;;  %p151_p5 = scmp.eq.s32.totalorder %s467_s22, 1 }
   0x9   : > { %p724_p4 = por %p145_p2, %p144_p1  ;;  %s129_s26 = ssub.s32 %s648_s19, %s833_s23 }
   0xa   : > { %p471_p6 = scmp.ge.s32.totalorder %s652_s20, 1  ;;  %p132_p7 = scmp.eq.s32.totalorder %s129_s26, 0 }
   0xb   : > { %p731_p8 = por %p151_p5, %p150_p3  ;;  %p197_p9 = scmp.lt.s32.totalorder %s652_s20, 3 }
   0xc   : > { %s737_s28 = scalar_select %p132_p7, %s640_s17, %s134_s24  }
   0xd   : > { %p198_p10 = pnand %p471_p6, %p197_p9 }
   0xe   : > { %v569_v0 = vld [vmem:[%s821_s1] sm:$0xff] (!%p198_p10)   ;;  %v654_v1 = vmov (!%p198_p10), 0.0   ;;  %v570_v2 = vld [vmem:[%s821_s1 + $0x8] sm:$0xff] (!%p198_p10)   ;;  %vm655_vm0 = vmmov (!%p198_p10), 0   ;;  %p233_p11 = scmp.lt.s32.totalorder (!%p198_p10), %s644_s18, 1  ;;  %v571_v3 = vld [vmem:[%s821_s1 + $0x10] sm:$0xff] (!%p198_p10)  }
   0xf   : > { %201 = sbr.rel (%p198_p10) target bundleno = 266 (0x10a), region = 36  ;;  %498 = vmatprep.subr.bf16.mxu0 (!%p198_p10), %v654_v1  ;;  %506 = vmatprep.mubr.msk.bf16.mxu0 (!%p198_p10), %vm655_vm0, %v654_v1  ;;  %v572_v4 = vld [vmem:[%s821_s1 + $0x18] sm:$0xff] (!%p198_p10)   ;;  %vm296_vm1 = vcmask (!%p198_p10), 523264   ;;  %s229_s22 = sand.u32 (!%p198_p10), 1, %s636_s16   ;;  %v475_v6 = vld [vmem:[%s822_s2] ss:$0 sm:$0xff] (!%p198_p10) }
  0x10   : > { %499 = vmatpush3.bf16.msra.mxu0 (!%p198_p10), %v569_v0  ;;  %s472_s24 = sshll.u32 (!%p198_p10), %s229_s22, 3  ;;  %v341_v8 = vld [vmem:[%s823_s3] sm:$0xff] (!%p198_p10)  ;;  %v342_v12 = vld [vmem:[%s823_s3 + $0x8] sm:$0xff] (!%p198_p10)  ;;  %s492_s8 = sshll.u32 (!%p198_p10), %s644_s18, 7  ;;  %vm353_vm2 = vcmask (!%p198_p10), 257024  }
  0x11   : > { %500 = vmatprep.subr.bf16.mxu0 (!%p198_p10), %v654_v1  ;;  %s231_s9 = scalar_lea.vmem (!%p198_p10), [#allocation2], %s472_s24  ;;  %s774_s14 = scalar_lea.sflag (!%p198_p10), [#allocation3], %s229_s22 }
  0x12   : > { %s656_s21 = smov (!%p198_p10), [#allocation2]  }
  0x13   : > { %s578_s24 = sshll.u32 (!%p198_p10), %s656_s21, 4  ;;  %s579_s24 = int_to_ptr.vmem [resolvable:$false] %s578_s24 }
  0x14   : > { %501 = vmatpush3.bf16.msra.mxu0 (!%p198_p10), %v570_v2  ;;  %s580_s26 = scalar_lea.vmem (!%p198_p10), %s579_s24, 256 }
  0x15   : > { %502 = vmatprep.subr.bf16.mxu0 (!%p198_p10), %v654_v1 }
  0x16   : > { %s234_s7 = scalar_select %p233_p11, %s644_s18, 1 }
  0x18   : > { %s489_s10 = sshll.u32 %s234_s7, 3  ;;  %503 = vmatpush3.bf16.msra.mxu0 %v571_v3 }
  0x19   : > { %s240_s13 = scalar_lea.vmem %s820_s0, %s489_s10  ;;  %504 = vmatprep.subr.bf16.mxu0 %v654_v1  ;;  %s372_s10 = sshll.u32 %s231_s9, 4  ;;  %s772_s10 = int_to_ptr.vmem [resolvable:$true] %s372_s10 }
  0x1a   : > { %v573_v5 = vld [vmem:[%s240_s13] sm:$0xff]   ;;  %s770_s13 = scalar_lea.hbm %s824_s4, %s492_s8  ;;  %s574_s18 = scalar_lea.vmem %s772_s10, 128 }
  0x1b   : > { %p575_p12 = scmp.ne.s32.totalorder %s772_s10, %s574_s18  ;;  %p581_p1 = scmp.lt.s32.totalorder %s772_s10, %s579_s24 }
  0x1c   : > { %505 = vmatpush3.bf16.msra.mxu0 %v572_v4  ;;  %p582_p2 = scmp.lt.s32.totalorder %s580_s26, %s574_s18 }
  0x1d   : > { %p576_p13 = pnand %p575_p12, %p724_p4 }
  0x1e   : > { %p583_p3 = por %p582_p2, %p581_p1 }
  0x1f   : > { %507 = vmatmul.mubr.msk.bf16.vlgmr.msra.gmra.mrb[0].mxu0 %vm296_vm1, %v573_v5  ;;  %p577_p0 = pneg %p576_p13 }
  0x21   : > { %p584_p5 = pnand %p583_p3, %p577_p0 }
  0xf2   : > { %v334_v7 = vpop.f32.mrb[0].mxu0 }
  0xf3   : > { %v335_v9 = vadd.f32 %v475_v6, %v334_v7  ;;  %v508_v10 = vpop.f32.mrb[1].mxu0 }
  0xf4   : > { %v337_v11 = vpop.f32.mrb[2].mxu0 }
  0xf5   : > { %v343_v13 = vadd.f32 %v341_v8, %v335_v9  ;;  %v338_v14 = vadd.f32 %v475_v6, %v337_v11  ;;  %v509_v15 = vpop.f32.mrb[3].mxu0 }
  0xf7   : > { %v490_v16 = vpack.c.bf16 %v343_v13, %v343_v13  ;;  %v344_v17 = vadd.f32 %v342_v12, %v338_v14 }
  0xf9   : > { %354 = vst.msk [vmem:[%s231_s9] sm:$0xf] %vm353_vm2, %v490_v16  ;;  %v491_v18 = vpack.c.bf16 %v344_v17, %v344_v17 }
  0xfb   : > { %355 = vst.msk [vmem:[%s231_s9 + $0x4] sm:$0xf] %vm353_vm2, %v491_v18 }
  0xfc   : > { %587 = shalt.err (!%p584_p5)
}
  0xfd   : > { %s588_s22 = scalar_lea.hbm %s770_s13, 128  ;;  %s592_s5 = scalar_lea.hbm %s824_s4, 256 }
  0xfe   : > { %p589_p6 = scmp.ne.s32.totalorder %s770_s13, %s588_s22  ;;  %p593_p10 = scmp.lt.u32.totalorder %s770_s13, %s824_s4 }
  0xff   : > { %p594_p11 = scmp.lt.u32.totalorder %s592_s5, %s588_s22  ;;  %p596_p13 = scmp.lt.u32.totalorder %s588_s22, %s770_s13 }
 0x100   : > { %p590_p7 = pnand %p589_p6, %p724_p4 }
 0x101   : > { %p595_p12 = por %p594_p11, %p593_p10 }
 0x102   : > { %p591_p9 = pneg %p590_p7 }
 0x103   : > { %p597_p0 = por %p596_p13, %p595_p12 }
 0x105   : > { %p598_p1 = pnand %p597_p0, %p591_p9 }
 0x107   : > { %601 = shalt.err (!%p598_p1)
}
 0x108   : > { %s657_s8 = smov 64   ;;  %s658_s9 = smov 4  }
 0x109   : > { %510 = dma.vmem_to_hbm [thread:$0]  (%p724_p4), %s772_s10, 128, %s770_s13, %s774_s14, %s657_s8, %s657_s8, %s658_s9  }
 0x10a PF: > { %p516_p2 = scmp.ge.s32.totalorder %s652_s20, 2  ;;  %s387_s11 = sand.u32 1, %s632_s15  }
 0x10b   : > { %s388_s12 = scalar_lea.sflag [#allocation3], %s387_s11 }
 0x10c   : > { %p513_p3 = pnand %p516_p2, %p731_p8 }
 0x10e   : > { %627 = dma.done.wait (!%p513_p3), %s388_s12, 128  }
 0x10f   : > { %629 = vsyncadd (!%p513_p3), %s388_s12, 4294967168  ;;  %s17_s20 = sadd.s32 1, %s652_s20   ;;  %s827_s15 = smov %s636_s16 }
 0x110   : > { %p14_p5 = scmp.ge.s32.totalorder %s17_s20, 4   ;;  %s828_s16 = smov %s640_s17 }
 0x111   : > { %s829_s17 = smov %s737_s28  ;;  %s830_s18 = smov %s648_s19 }
 0x112   : > { %s831_s19 = smov %s833_s23  ;;  %16 = sbr.rel (!%p14_p5) target bundleno = 4 (0x4), region = 74 }
 0x119   :  { %393 = vsyncpa [#allocation3], 1 }
 0x11a   :  { %395 = vsyncpa [#allocation3 + $0x1], 1 }

</bundles_post_ra>
